<compile_context>
chip_gen: v7x
topology: tpu7x:2x2x1
jax: 0.10.0
libtpu: 0.0.40
codegen_flags: <defaults>
</compile_context>

<pallas_src>
import functools

import jax
import jax.numpy as jnp
from jax.experimental import pallas as pl
from jax.experimental.pallas import tpu as pltpu

LANE = 128      # TPU lane width (feature padding target)
SUBLANE = 8     # TPU sublane granularity
TB_MAX = 1024   # max batch-tile rows (well under VMEM budget on v5e/v6e/v7x)


def _round_up(n, m):
    return (n + m - 1) // m * m


def mlp_kernel(x_ref, p_ref, o_ref, *, compute_dtype):
    """Fused 3-layer MLP on one (TB, 128) batch tile.

    x_ref: (TB, 128)        padded activations (compute_dtype)
    p_ref: (3, 136, 128)    per-layer slab = [128x128 padded weight ; 8x128 bias block]
    o_ref: (TB, 128)        padded f32 output (cols >= 3 are zero)
    """

    def dense(h, layer, apply_relu):
        w = p_ref[layer, 0:LANE, :]                                   # (128, 128)
        b = p_ref[layer, LANE:LANE + SUBLANE, :][0:1, :].astype(jnp.float32)  # (1, 128)
        y = jnp.dot(h.astype(compute_dtype), w,
                    preferred_element_type=jnp.float32) + b
        return jnp.maximum(y, 0.0) if apply_relu else y

    h = x_ref[...]
    h = dense(h, 0, True)    # layer1 + relu
    h = dense(h, 1, True)    # layer2 + relu
    h = dense(h, 2, False)   # layer3 (logits)
    o_ref[...] = h.astype(o_ref.dtype)


def pack_params(params, dtype):
    """Pack (w1,b1,w2,b2,w3,b3) into one (3, 136, 128) zero-padded buffer."""
    w1, b1, w2, b2, w3, b3 = params
    slabs = []
    for w, b in ((w1, b1), (w2, b2), (w3, b3)):
        wp = jnp.zeros((LANE, LANE), dtype).at[:w.shape[0], :w.shape[1]].set(
            w.astype(dtype))
        bp = jnp.zeros((SUBLANE, LANE), dtype).at[0, :b.reshape(-1).shape[0]].set(
            b.reshape(-1).astype(dtype))
        slabs.append(jnp.concatenate([wp, bp], axis=0))               # (136, 128)
    return jnp.stack(slabs, axis=0)                                   # (3, 136, 128)


def network_forward(x, params, *, compute_dtype=jnp.float32, tb_max=TB_MAX):
    """Run the fused MLP kernel. x: (B, input_size); returns (B, output_size) f32.

    compute_dtype: jnp.float32 (default; best on v5e) or jnp.bfloat16 (v6e/v7x).
    """
    B, in_features = x.shape
    out_features = params[4].shape[1]                                 # w3: (24, out)

    TB = min(tb_max, _round_up(B, SUBLANE))
    Bp = _round_up(B, TB)

    # Lane-dense, sublane-aligned input padding.
    x_pad = jnp.zeros((Bp, LANE), compute_dtype).at[:B, :in_features].set(
        x.astype(compute_dtype))
    p = pack_params(params, compute_dtype)

    grid = (Bp // TB,)
    itemsize = jnp.dtype(compute_dtype).itemsize
    cost = pl.CostEstimate(
        flops=2 * Bp * LANE * LANE * 3,
        transcendentals=0,
        bytes_accessed=Bp * LANE * itemsize + p.size * itemsize + Bp * LANE * 4,
    )

    out_padded = pl.pallas_call(
        functools.partial(mlp_kernel, compute_dtype=compute_dtype),
        out_shape=jax.ShapeDtypeStruct((Bp, LANE), jnp.float32),
        grid=grid,
        in_specs=[
            pl.BlockSpec((TB, LANE), lambda i: (i, 0)),        # batch-tiled activations
            pl.BlockSpec(p.shape, lambda i: (0, 0, 0)),        # params: fetched once, resident
        ],
        out_specs=pl.BlockSpec((TB, LANE), lambda i: (i, 0)),  # lane-dense output tile
        compiler_params=pltpu.CompilerParams(
            dimension_semantics=("parallel",),                 # megacore split on v7x
        ),
        cost_estimate=cost,
    )(x_pad, p)

    return out_padded[:B, :out_features]


def init_params(key, input_size, output_size, hidden=24):
    """Deterministic init matching nn.Linear shapes (stored transposed: [in, out])."""
    ks = jax.random.split(key, 6)

    def linear(kw, kb, fan_in, fan_out):
        bound = 1.0 / jnp.sqrt(fan_in)
        w = jax.random.uniform(kw, (fan_in, fan_out), jnp.float32, -bound, bound)
        b = jax.random.uniform(kb, (1, fan_out), jnp.float32, -bound, bound)
        return w, b

    w1, b1 = linear(ks[0], ks[1], input_size, hidden)     # layer1: Linear(input_size, 24)
    w2, b2 = linear(ks[2], ks[3], hidden, hidden)         # layer2: Linear(24, 24)
    w3, b3 = linear(ks[4], ks[5], hidden, output_size)    # layer3: Linear(24, output_size)
    return (w1, b1, w2, b2, w3, b3)


def reference_forward(x, params, compute_dtype=jnp.float32):
    """Pure-JAX reference mirroring the kernel's casting/accumulation."""
    w1, b1, w2, b2, w3, b3 = params

    def dense(h, w, b, apply_relu):
        y = jnp.dot(h.astype(compute_dtype), w.astype(compute_dtype),
                    preferred_element_type=jnp.float32)
        y = y + b.reshape(1, -1).astype(compute_dtype).astype(jnp.float32)
        return jnp.maximum(y, 0.0) if apply_relu else y

    h = dense(x, w1, b1, True)
    h = dense(h, w2, b2, True)
    return dense(h, w3, b3, False)


if __name__ == "__main__":
    key = jax.random.PRNGKey(0)
    k_x, k_x2, k_p = jax.random.split(key, 3)

    input_size = 4    # Iris features
    output_size = 3   # 3 Iris classes
    params = init_params(k_p, input_size, output_size)

    # 1) Small-batch f32 check (matches the original module's use case).
    batch = 8
    x = jax.random.normal(k_x, (batch, input_size), dtype=jnp.float32)
    out = jax.block_until_ready(network_forward(x, params))
    ref = reference_forward(x, params)
    assert out.shape == (batch, output_size)
    assert jnp.allclose(out, ref, atol=1e-4, rtol=1e-5), "f32 mismatch (small batch)"

    # 2) Large, non-multiple batch exercises batch tiling + padding + megacore split.
    big_batch = 2500
    xb = jax.random.normal(k_x2, (big_batch, input_size), dtype=jnp.float32)
    out_b = jax.block_until_ready(network_forward(xb, params))
    ref_b = reference_forward(xb, params)
    assert out_b.shape == (big_batch, output_size)
    assert jnp.allclose(out_b, ref_b, atol=1e-4, rtol=1e-5), "f32 mismatch (tiled batch)"

    # 3) bf16 compute path (recommended on v6e/v7x); reference mirrors the casts.
    out_bf16 = jax.block_until_ready(
        network_forward(xb, params, compute_dtype=jnp.bfloat16))
    ref_bf16 = reference_forward(xb, params, compute_dtype=jnp.bfloat16)
    assert jnp.allclose(out_bf16, ref_bf16, atol=2e-2, rtol=2e-2), "bf16 mismatch"

    print("KERNEL_OK")
</pallas_src>

<mosaic_0001>
module attributes {stable_mosaic.version = 11 : i64} {
  func.func @mlp_kernel(%arg0: i32, %arg1: memref<8x128xf32, #tpu.memory_space<vmem>>, %arg2: memref<3x136x128xf32, #tpu.memory_space<vmem>>, %arg3: memref<8x128xf32, #tpu.memory_space<vmem>>) attributes {dimension_semantics = [#tpu.dimension_semantics<parallel>], iteration_bounds = array<i64: 1>, scalar_prefetch = 0 : i64, scratch_operands = 0 : i64, tpu.core_type = #tpu.core_type<tc>, window_params = [{transform_indices = @transform_0, window_bounds = array<i64: 8, 128>}, {pipeline_mode = #tpu.pipeline_mode<synchronous>, transform_indices = @transform_1, window_bounds = array<i64: 3, 136, 128>}, {transform_indices = @transform_2, window_bounds = array<i64: 8, 128>}]} {
    %c0 = arith.constant 0 : index
    %c0_0 = arith.constant 0 : index
    %0 = vector.load %arg1[%c0, %c0_0] : memref<8x128xf32, #tpu.memory_space<vmem>>, vector<8x128xf32>
    %c0_1 = arith.constant 0 : index
    %c0_2 = arith.constant 0 : index
    %c0_3 = arith.constant 0 : index
    %1 = vector.load %arg2[%c0_1, %c0_2, %c0_3] : memref<3x136x128xf32, #tpu.memory_space<vmem>>, vector<1x128x128xf32>
    %2 = vector.shape_cast %1 : vector<1x128x128xf32> to vector<128x128xf32>
    %c0_4 = arith.constant 0 : index
    %c128 = arith.constant 128 : index
    %c0_5 = arith.constant 0 : index
    %3 = vector.load %arg2[%c0_4, %c128, %c0_5] : memref<3x136x128xf32, #tpu.memory_space<vmem>>, vector<1x8x128xf32>
    %4 = vector.shape_cast %3 : vector<1x8x128xf32> to vector<8x128xf32>
    %5 = vector.extract_strided_slice %4 {offsets = [0, 0], sizes = [1, 128], strides = [1, 1]} : vector<8x128xf32> to vector<1x128xf32>
    %cst = arith.constant dense<0.000000e+00> : vector<8x128xf32>
    %6 = tpu.matmul %0, %2, %cst {dimension_numbers = #tpu.dot_dimension_numbers<[1], [0], [0], [1], [0, 0, 1, 1], [], []>} : vector<8x128xf32>, vector<128x128xf32>, vector<8x128xf32> -> vector<8x128xf32>
    %7 = vector.broadcast %5 : vector<1x128xf32> to vector<8x128xf32>
    %8 = arith.addf %6, %7 : vector<8x128xf32>
    %cst_6 = arith.constant 0.000000e+00 : f32
    %9 = vector.broadcast %cst_6 : f32 to vector<8x128xf32>
    %10 = arith.maximumf %8, %9 : vector<8x128xf32>
    %c1 = arith.constant 1 : index
    %c0_7 = arith.constant 0 : index
    %c0_8 = arith.constant 0 : index
    %11 = vector.load %arg2[%c1, %c0_7, %c0_8] : memref<3x136x128xf32, #tpu.memory_space<vmem>>, vector<1x128x128xf32>
    %12 = vector.shape_cast %11 : vector<1x128x128xf32> to vector<128x128xf32>
    %c1_9 = arith.constant 1 : index
    %c128_10 = arith.constant 128 : index
    %c0_11 = arith.constant 0 : index
    %13 = vector.load %arg2[%c1_9, %c128_10, %c0_11] : memref<3x136x128xf32, #tpu.memory_space<vmem>>, vector<1x8x128xf32>
    %14 = vector.shape_cast %13 : vector<1x8x128xf32> to vector<8x128xf32>
    %15 = vector.extract_strided_slice %14 {offsets = [0, 0], sizes = [1, 128], strides = [1, 1]} : vector<8x128xf32> to vector<1x128xf32>
    %cst_12 = arith.constant dense<0.000000e+00> : vector<8x128xf32>
    %16 = tpu.matmul %10, %12, %cst_12 {dimension_numbers = #tpu.dot_dimension_numbers<[1], [0], [0], [1], [0, 0, 1, 1], [], []>} : vector<8x128xf32>, vector<128x128xf32>, vector<8x128xf32> -> vector<8x128xf32>
    %17 = vector.broadcast %15 : vector<1x128xf32> to vector<8x128xf32>
    %18 = arith.addf %16, %17 : vector<8x128xf32>
    %cst_13 = arith.constant 0.000000e+00 : f32
    %19 = vector.broadcast %cst_13 : f32 to vector<8x128xf32>
    %20 = arith.maximumf %18, %19 : vector<8x128xf32>
    %c2 = arith.constant 2 : index
    %c0_14 = arith.constant 0 : index
    %c0_15 = arith.constant 0 : index
    %21 = vector.load %arg2[%c2, %c0_14, %c0_15] : memref<3x136x128xf32, #tpu.memory_space<vmem>>, vector<1x128x128xf32>
    %22 = vector.shape_cast %21 : vector<1x128x128xf32> to vector<128x128xf32>
    %c2_16 = arith.constant 2 : index
    %c128_17 = arith.constant 128 : index
    %c0_18 = arith.constant 0 : index
    %23 = vector.load %arg2[%c2_16, %c128_17, %c0_18] : memref<3x136x128xf32, #tpu.memory_space<vmem>>, vector<1x8x128xf32>
    %24 = vector.shape_cast %23 : vector<1x8x128xf32> to vector<8x128xf32>
    %25 = vector.extract_strided_slice %24 {offsets = [0, 0], sizes = [1, 128], strides = [1, 1]} : vector<8x128xf32> to vector<1x128xf32>
    %cst_19 = arith.constant dense<0.000000e+00> : vector<8x128xf32>
    %26 = tpu.matmul %20, %22, %cst_19 {dimension_numbers = #tpu.dot_dimension_numbers<[1], [0], [0], [1], [0, 0, 1, 1], [], []>} : vector<8x128xf32>, vector<128x128xf32>, vector<8x128xf32> -> vector<8x128xf32>
    %27 = vector.broadcast %25 : vector<1x128xf32> to vector<8x128xf32>
    %28 = arith.addf %26, %27 : vector<8x128xf32>
    %c0_20 = arith.constant 0 : index
    %c0_21 = arith.constant 0 : index
    %29 = vector.load %arg3[%c0_20, %c0_21] : memref<8x128xf32, #tpu.memory_space<vmem>>, vector<8x128xf32>
    tpu.vector_store %arg3[%c0_20, %c0_21], %28 {strides = array<i32>} : memref<8x128xf32, #tpu.memory_space<vmem>>, vector<8x128xf32>,
    return
  }
  func.func @transform_0(%arg0: i32) -> (i32, i32) {
    %c0_i32 = arith.constant 0 : i32
    %c0_i32_0 = arith.constant 0 : i32
    return %arg0, %c0_i32 : i32, i32
  }
  func.func @transform_1(%arg0: i32) -> (i32, i32, i32) {
    %c0_i32 = arith.constant 0 : i32
    %c0_i32_0 = arith.constant 0 : i32
    %c0_i32_1 = arith.constant 0 : i32
    %c0_i32_2 = arith.constant 0 : i32
    return %c0_i32, %c0_i32_0, %c0_i32_1 : i32, i32, i32
  }
  func.func @transform_2(%arg0: i32) -> (i32, i32) {
    %c0_i32 = arith.constant 0 : i32
    %c0_i32_0 = arith.constant 0 : i32
    return %arg0, %c0_i32 : i32, i32
  }
}

</mosaic_0001>

<bundles_post_ra>
// kernel: tpu_custom_call.1
= control target key start
LH: loop header
LB: loop body
LE: loop exit
PB: predicated region body
PF: predicated region fallthrough
CT: control target
= control target key end

     0   :  { %7 = vsyncpa [#allocation3], 0  ;;  %s737_s0 = inlined_call_operand.hbm [shape: f32[8,128], index: 0, kind: input, shape index: {}]   ;;  %s738_s1 = inlined_call_operand.hbm [shape: f32[3,136,128], index: 1, kind: input, shape index: {}]   ;;  %s739_s2 = inlined_call_operand.hbm [shape: f32[8,128], index: 2, kind: output, shape index: {}]  }
   0x1   :  { %8 = vsyncpa [#allocation6], 0 }
   0x2   :  { %9 = vsyncpa [#allocation4], 0  ;;  %s641_s9 = smov [#allocation2]   ;;  %s642_s11 = smov [#allocation5]  }
   0x3   :  { %s16_s10 = sshll.u32 %s641_s9, 4  ;;  %s25_s12 = sshll.u32 %s642_s11, 4  ;;  %s17_s10 = int_to_ptr.vmem [resolvable:$true] %s16_s10  ;;  %s664_s12 = int_to_ptr.vmem [resolvable:$true] %s25_s12 }
   0x4   :  { %s569_s15 = scalar_lea.hbm %s737_s0, 128 }
   0x5   :  { %p570_p0 = scmp.ne.s32.totalorder %s737_s0, %s569_s15  ;;  %p573_p1 = scmp.lt.u32.totalorder %s569_s15, %s737_s0 }
   0x7   :  { %p575_p2 = pnand %p573_p1, %p570_p0 }
   0x9   :  { %578 = shalt.err (!%p575_p2)
}
   0xa   :  { %s579_s20 = scalar_lea.vmem %s17_s10, 128  ;;  %p584_p4 = scmp.lt.s32.totalorder %s17_s10, %s17_s10 }
   0xb   :  { %p580_p3 = scmp.ne.s32.totalorder %s17_s10, %s579_s20  ;;  %p585_p5 = scmp.lt.s32.totalorder %s579_s20, %s579_s20 }
   0xd   :  { %p586_p6 = por %p585_p5, %p584_p4 }
   0xf   :  { %p587_p7 = pnand %p586_p6, %p580_p3 }
  0x11   :  { %590 = shalt.err (!%p587_p7)
}
  0x12   :  { %19 = dma.hbm_to_vmem [thread:$0]  %s737_s0, 128, %s17_s10, [#allocation3]  }
  0x13   :  { %s591_s25 = scalar_lea.hbm %s738_s1, 6528 }
  0x14   :  { %p592_p8 = scmp.ne.s32.totalorder %s738_s1, %s591_s25  ;;  %p595_p9 = scmp.lt.u32.totalorder %s591_s25, %s738_s1 }
  0x16   :  { %p597_p10 = pnand %p595_p9, %p592_p8 }
  0x18   :  { %600 = shalt.err (!%p597_p10)
}
  0x19   :  { %s601_s30 = scalar_lea.vmem %s664_s12, 6528  ;;  %p606_p12 = scmp.lt.s32.totalorder %s664_s12, %s664_s12 }
  0x1a   :  { %p602_p11 = scmp.ne.s32.totalorder %s664_s12, %s601_s30  ;;  %p607_p13 = scmp.lt.s32.totalorder %s601_s30, %s601_s30 }
  0x1c   :  { %p608_p0 = por %p607_p13, %p606_p12 }
  0x1e   :  { %p609_p1 = pnand %p608_p0, %p602_p11 }
  0x20   :  { %612 = shalt.err (!%p609_p1)
}
  0x21   :  { %s643_s0 = smov 128   ;;  %s644_s3 = smov 8  }
  0x22   :  { %31 = dma.hbm_to_vmem [thread:$0]  %s738_s1, 6528, %s664_s12, [#allocation6], %s643_s0, %s643_s0, %s644_s3  }
  0x23   :  { %635 = dma.done.wait [#allocation3], 128  }
  0x24   :  { %636 = vsyncadd [#allocation3], 4294967168 }
  0x25   :  { %637 = dma.done.wait [#allocation6], 6528  }
  0x26   :  { %638 = vsyncadd [#allocation6], 4294960768  ;;  %v645_v0 = vmov 0.0|0.0   ;;  %vm646_vm0 = vmmov 0   ;;  %v647_v1 = vmov 0.0   ;;  %v39_v2 = vld [vmem:[#allocation5] sm:$0xff] }
  0x27   :  { %489 = vmatprep.subr.bf16.mxu0 %v645_v0  ;;  %416 = vmatprep.mubr.msk.f32.mxu0 %vm646_vm0, %v647_v1  ;;  %v40_v3 = vld [vmem:[#allocation5 + $0x8] sm:$0xff]  ;;  %v41_v4 = vld [vmem:[#allocation5 + $0x10] sm:$0xff]  ;;  %v42_v6 = vld [vmem:[#allocation5 + $0x18] sm:$0xff]  ;;  %s648_s1 = smov [#allocation7]  }
  0x28   :  { %513 = vmatprep.subr.bf16.mxu1 %v645_v0  ;;  %451 = vmatprep.mubr.msk.f32.mxu1 %vm646_vm0, %v647_v1  ;;  %v490_v5 = vpack.c.bf16 %v40_v3, %v39_v2  ;;  %v493_v7 = vpack.c.bf16 %v42_v6, %v41_v4  ;;  %v43_v8 = vld [vmem:[#allocation5 + $0x20] sm:$0xff]  ;;  %v44_v9 = vld [vmem:[#allocation5 + $0x28] sm:$0xff]  ;;  %v133_v11 = vld [vmem:[#allocation5 + $0x90] sm:$0xff]  ;;  %s323_s6 = sshll.u32 %s648_s1, 4  ;;  %s324_s6 = int_to_ptr.vmem [resolvable:$true] %s323_s6 }
  0x29   :  { %v132_v10 = vld [vmem:[#allocation5 + $0x88] sm:$0xff]  ;;  %v134_v12 = vld [vmem:[#allocation5 + $0x98] sm:$0xff]  ;;  %v135_v13 = vld [vmem:[#allocation5 + $0xa0] sm:$0xff]  ;;  %v496_v14 = vpack.c.bf16 %v44_v9, %v43_v8  ;;  %v56_v9 = vlaneseq  ;;  %s613_s7 = scalar_lea.vmem %s324_s6, 128  ;;  %p618_p3 = scmp.lt.s32.totalorder %s324_s6, %s324_s6 }
  0x2a   :  { %491 = vmatpush3.bf16.msra.mxu0 %v490_v5  ;;  %v514_v15 = vpack.c.bf16 %v133_v11, %v132_v10  ;;  %v45_v16 = vld [vmem:[#allocation5 + $0x30] sm:$0xff]  ;;  %v46_v17 = vld [vmem:[#allocation5 + $0x38] sm:$0xff]  ;;  %v517_v18 = vpack.c.bf16 %v135_v13, %v134_v12  ;;  %v136_v19 = vld [vmem:[#allocation5 + $0xa8] sm:$0xff]  ;;  %p614_p2 = scmp.ne.s32.totalorder %s324_s6, %s613_s7  ;;  %p619_p4 = scmp.lt.s32.totalorder %s613_s7, %s613_s7 }
  0x2b   :  { %492 = vmatprep.subr.bf16.mxu0 %v645_v0  ;;  %v137_v20 = vld [vmem:[#allocation5 + $0xb0] sm:$0xff]  ;;  %v499_v21 = vpack.c.bf16 %v46_v17, %v45_v16  ;;  %v47_v22 = vld [vmem:[#allocation5 + $0x40] sm:$0xff]  ;;  %v48_v23 = vld [vmem:[#allocation5 + $0x48] sm:$0xff]  ;;  %v57_v10 = vshrl.u32 %v56_v9, 7 }
  0x2c   :  { %515 = vmatpush3.bf16.msra.mxu1 %v514_v15  ;;  %v520_v24 = vpack.c.bf16 %v137_v20, %v136_v19  ;;  %v138_v25 = vld [vmem:[#allocation5 + $0xb8] sm:$0xff]  ;;  %v139_v26 = vld [vmem:[#allocation5 + $0xc0] sm:$0xff]  ;;  %v502_v27 = vpack.c.bf16 %v48_v23, %v47_v22  ;;  %v49_v28 = vld [vmem:[#allocation5 + $0x50] sm:$0xff]  ;;  %p620_p5 = por %p619_p4, %p618_p3 }
  0x2d   :  { %516 = vmatprep.subr.bf16.mxu1 %v645_v0  ;;  %v50_v29 = vld [vmem:[#allocation5 + $0x58] sm:$0xff]  ;;  %v523_v30 = vpack.c.bf16 %v139_v26, %v138_v25  ;;  %v140_v31 = vld [vmem:[#allocation5 + $0xc8] sm:$0xff]  ;;  %v141_v32 = vld [vmem:[#allocation5 + $0xd0] sm:$0xff]  ;;  %v58_v11 = vsub.s32 0, %v57_v10 }
  0x2e   :  { %494 = vmatpush3.bf16.msra.mxu0 %v493_v7  ;;  %v505_v33 = vpack.c.bf16 %v50_v29, %v49_v28  ;;  %v51_v34 = vld [vmem:[#allocation5 + $0x60] sm:$0xff]  ;;  %v52_v35 = vld [vmem:[#allocation5 + $0x68] sm:$0xff]  ;;  %v526_v36 = vpack.c.bf16 %v141_v32, %v140_v31  ;;  %v142_v37 = vld [vmem:[#allocation5 + $0xd8] sm:$0xff]  ;;  %p621_p6 = pnand %p620_p5, %p614_p2 }
  0x2f   :  { %495 = vmatprep.subr.bf16.mxu0 %v645_v0  ;;  %v143_v38 = vld [vmem:[#allocation5 + $0xe0] sm:$0xff]  ;;  %v508_v39 = vpack.c.bf16 %v52_v35, %v51_v34  ;;  %v53_v40 = vld [vmem:[#allocation5 + $0x70] sm:$0xff]  ;;  %v54_v41 = vld [vmem:[#allocation5 + $0x78] sm:$0xff] }
  0x30   :  { %518 = vmatpush3.bf16.msra.mxu1 %v517_v18  ;;  %v529_v42 = vpack.c.bf16 %v143_v38, %v142_v37  ;;  %v144_v43 = vld [vmem:[#allocation5 + $0xe8] sm:$0xff]  ;;  %v145_v44 = vld [vmem:[#allocation5 + $0xf0] sm:$0xff]  ;;  %v511_v45 = vpack.c.bf16 %v54_v41, %v53_v40  ;;  %v38_v47 = vld [vmem:[#allocation2] sm:$0xff] }
  0x31   :  { %519 = vmatprep.subr.bf16.mxu1 %v645_v0  ;;  %v532_v46 = vpack.c.bf16 %v145_v44, %v144_v43  ;;  %v146_v48 = vld [vmem:[#allocation5 + $0xf8] sm:$0xff]  ;;  %v147_v49 = vld [vmem:[#allocation5 + $0x100] sm:$0xff]  ;;  %v225_v51 = vld [vmem:[#allocation5 + $0x110] sm:$0xff] }
  0x32   :  { %497 = vmatpush3.bf16.msra.mxu0 %v496_v14  ;;  %v535_v50 = vpack.c.bf16 %v147_v49, %v146_v48  ;;  %v226_v52 = vld [vmem:[#allocation5 + $0x118] sm:$0xff]  ;;  %v227_v53 = vld [vmem:[#allocation5 + $0x120] sm:$0xff]  ;;  %v228_v55 = vld [vmem:[#allocation5 + $0x128] sm:$0xff] }
  0x33   :  { %498 = vmatprep.subr.bf16.mxu0 %v645_v0  ;;  %v538_v54 = vpack.c.bf16 %v226_v52, %v225_v51  ;;  %v541_v56 = vpack.c.bf16 %v228_v55, %v227_v53  ;;  %v229_v57 = vld [vmem:[#allocation5 + $0x130] sm:$0xff]  ;;  %v230_v58 = vld [vmem:[#allocation5 + $0x138] sm:$0xff]  ;;  %v231_v60 = vld [vmem:[#allocation5 + $0x140] sm:$0xff] }
  0x34   :  { %521 = vmatpush3.bf16.msra.mxu1 %v520_v24  ;;  %v544_v59 = vpack.c.bf16 %v230_v58, %v229_v57  ;;  %v232_v61 = vld [vmem:[#allocation5 + $0x148] sm:$0xff]  ;;  %v233_v63 = vld [vmem:[#allocation5 + $0x150] sm:$0xff]  ;;  %v235_v3 = vld [vmem:[#allocation5 + $0x160] sm:$0xff] }
  0x35   :  { %522 = vmatprep.subr.bf16.mxu1 %v645_v0  ;;  %v547_v62 = vpack.c.bf16 %v232_v61, %v231_v60  ;;  %v236_v4 = vld [vmem:[#allocation5 + $0x168] sm:$0xff]  ;;  %v237_v6 = vld [vmem:[#allocation5 + $0x170] sm:$0xff]  ;;  %v238_v7 = vld [vmem:[#allocation5 + $0x178] sm:$0xff] }
  0x36   :  { %500 = vmatpush3.bf16.msra.mxu0 %v499_v21  ;;  %v553_v5 = vpack.c.bf16 %v236_v4, %v235_v3  ;;  %v556_v8 = vpack.c.bf16 %v238_v7, %v237_v6  ;;  %v55_v12 = vld [vmem:[#allocation5 + $0x80] sm:$0xff]  ;;  %v240_v19 = vld [vmem:[#allocation5 + $0x188] sm:$0xff]  ;;  %v241_v26 = vld [vmem:[#allocation5 + $0x190] sm:$0xff] }
  0x37   :  { %501 = vmatprep.subr.bf16.mxu0 %v645_v0  ;;  %v59_v13 = vrot.slane %v55_v12, %v58_v11  ;;  %v239_v18 = vld [vmem:[#allocation5 + $0x180] sm:$0xff]  ;;  %v148_v21 = vld [vmem:[#allocation5 + $0x108] sm:$0xff] }
  0x38   :  { %524 = vmatpush3.bf16.msra.mxu1 %v523_v30  ;;  %v559_v20 = vpack.c.bf16 %v240_v19, %v239_v18  ;;  %v152_v22 = vrot.slane %v148_v21, %v58_v11 }
  0x39   :  { %525 = vmatprep.subr.bf16.mxu1 %v645_v0 }
  0x3a   :  { %503 = vmatpush3.bf16.msra.mxu0 %v502_v27  ;;  %v245_v27 = vrot.slane %v241_v26, %v58_v11 }
  0x3b   :  { %504 = vmatprep.subr.bf16.mxu0 %v645_v0 }
  0x3c   :  { %527 = vmatpush3.bf16.msra.mxu1 %v526_v36 }
  0x3d   :  { %528 = vmatprep.subr.bf16.mxu1 %v645_v0 }
  0x3e   :  { %506 = vmatpush3.bf16.msra.mxu0 %v505_v33 }
  0x3f   :  { %507 = vmatprep.subr.bf16.mxu0 %v645_v0 }
  0x40   :  { %530 = vmatpush3.bf16.msra.mxu1 %v529_v42 }
  0x41   :  { %531 = vmatprep.subr.bf16.mxu1 %v645_v0 }
  0x42   :  { %509 = vmatpush3.bf16.msra.mxu0 %v508_v39 }
  0x43   :  { %510 = vmatprep.subr.bf16.mxu0 %v645_v0 }
  0x44   :  { %533 = vmatpush3.bf16.msra.mxu1 %v532_v46 }
  0x45   :  { %534 = vmatprep.subr.bf16.mxu1 %v645_v0 }
  0x46   :  { %512 = vmatpush3.bf16.msra.mxu0 %v511_v45 }
  0x47   :  { %537 = vmatprep.subr.bf16.mxu0 %v645_v0 }
  0x48   :  { %536 = vmatpush3.bf16.msra.mxu1 %v535_v50 }
  0x49   :  { %417 = vmatmul.mubr.f32.vlgmr.msra.gmra.mrb[0].mxu0 %v38_v47 }
  0x4a   :  { %486 = vmatprep.mubr.msk.f32.mxu0 %vm646_vm0, %v647_v1  ;;  %539 = vmatpush3.bf16.msra.mxu0 %v538_v54  ;;  %v234_v1 = vld [vmem:[#allocation5 + $0x158] sm:$0xff] }
  0x4b   :  { %540 = vmatprep.subr.bf16.mxu0 %v645_v0  ;;  %v550_v2 = vpack.c.bf16 %v234_v1, %v233_v63 }
  0x4e   :  { %542 = vmatpush3.bf16.msra.mxu0 %v541_v56 }
  0x4f   :  { %543 = vmatprep.subr.bf16.mxu0 %v645_v0 }
  0x52   :  { %545 = vmatpush3.bf16.msra.mxu0 %v544_v59 }
  0x53   :  { %546 = vmatprep.subr.bf16.mxu0 %v645_v0 }
  0x56   :  { %548 = vmatpush3.bf16.msra.mxu0 %v547_v62 }
  0x57   :  { %549 = vmatprep.subr.bf16.mxu0 %v645_v0 }
  0x5a   :  { %551 = vmatpush3.bf16.msra.mxu0 %v550_v2 }
  0x5b   :  { %552 = vmatprep.subr.bf16.mxu0 %v645_v0 }
  0x5e   :  { %554 = vmatpush3.bf16.msra.mxu0 %v553_v5 }
  0x5f   :  { %555 = vmatprep.subr.bf16.mxu0 %v645_v0 }
  0x62   :  { %557 = vmatpush3.bf16.msra.mxu0 %v556_v8 }
  0x63   :  { %558 = vmatprep.subr.bf16.mxu0 %v645_v0 }
  0x66   :  { %560 = vmatpush3.bf16.msra.mxu0 %v559_v20 }
 0x11c   :  { %v126_v14 = vpop.f32.mrb[0].mxu0 }
 0x11d   :  { %v127_v15 = vadd.f32 %v126_v14, %v59_v13  ;;  %v418_v16 = vpop.f32.mrb[1].mxu0 }
 0x11f   :  { %v130_v17 = vmax.f32 %v127_v15, 0.0 }
 0x121   :  { %452 = vmatmul.mubr.f32.vlgmr.msra.gmra.mrb[0].mxu1 %v130_v17 }
 0x1f4   :  { %v219_v23 = vpop.f32.mrb[0].mxu1 }
 0x1f5   :  { %v220_v24 = vadd.f32 %v219_v23, %v152_v22  ;;  %v453_v25 = vpop.f32.mrb[1].mxu1 }
 0x1f7   :  { %v223_v0 = vmax.f32 %v220_v24, 0.0 }
 0x1f9   :  { %487 = vmatmul.mubr.f32.vlgmr.msra.gmra.mrb[2].mxu0 %v223_v0 }
 0x2cc   :  { %v312_v28 = vpop.f32.mrb[2].mxu0 }
 0x2cd   :  { %v313_v29 = vadd.f32 %v312_v28, %v245_v27  ;;  %v488_v30 = vpop.f32.mrb[3].mxu0 }
 0x2cf   :  { %316 = vst [vmem:[#allocation7] sm:$0xff] %v313_v29 }
 0x2d0   :  { %624 = shalt.err (!%p621_p6)
}
 0x2d1   :  { %s625_s10 = scalar_lea.hbm %s739_s2, 128 }
 0x2d2   :  { %p626_p7 = scmp.ne.s32.totalorder %s739_s2, %s625_s10  ;;  %p629_p8 = scmp.lt.u32.totalorder %s625_s10, %s739_s2 }
 0x2d4   :  { %p631_p9 = pnand %p629_p8, %p626_p7 }
 0x2d6   :  { %634 = shalt.err (!%p631_p9)
}
 0x2d7   :  { %326 = dma.vmem_to_hbm [thread:$0]  %s324_s6, 128, %s739_s2, [#allocation4]  }
 0x2d8   :  { %639 = dma.done.wait [#allocation4], 128  }
 0x2d9   :  { %640 = vsyncadd [#allocation4], 4294967168 }
 0x2da   :  { %330 = vsyncpa [#allocation3], 1 }
 0x2db   :  { %331 = vsyncpa [#allocation6], 1 }
 0x2dc   :  { %332 = vsyncpa [#allocation4], 1 }

</bundles_post_ra>
